<compile_context>
chip_gen: v7x
topology: tpu7x:2x2x1
jax: 0.10.0
libtpu: 0.0.40
codegen_flags: <defaults>
</compile_context>

<pallas_src>
import jax
import jax.numpy as jnp
from jax.experimental import pallas as pl
from jax.experimental.pallas import tpu as pltpu


def _round_up(x, m):
    return ((x + m - 1) // m) * m


def _fusion_kernel(ws_ref, supp_ref, query_ref, out_ref):
    # ws_ref   : (RT, 1)   per-row (= per n*C+c) support weight
    # supp_ref / query_ref / out_ref : (RT, TS)
    ws = ws_ref[...]                      # (RT, 1) broadcasts over lanes
    s = supp_ref[...]
    q = query_ref[...]
    # out = ws*s + (1-ws)*q  ==  q + ws*(s - q)
    out_ref[...] = (q + ws * (s - q)).astype(out_ref.dtype)


def weight_fusion(supp, query, supp_weight,
                  *, row_tile=256, spatial_tile=1024,
                  vmem_limit_bytes=32 * 1024 * 1024):
    """supp, query: (N, C, D, H, W). supp_weight: (C,)."""
    N, C, D, H, W = supp.shape
    S = D * H * W
    R = N * C
    dtype = supp.dtype

    supp_f = supp.reshape(R, S)
    query_f = query.reshape(R, S)
    # Row r = n*C + c gets weight supp_weight[c].
    ws_rows = jnp.tile(supp_weight.astype(dtype).reshape(1, C), (N, 1)).reshape(R, 1)

    # Tile sizes: sublane-multiple rows, lane-multiple spatial width, capped so
    # small problems use a single full-extent block.
    RT = min(row_tile, _round_up(R, 8))
    TS = min(spatial_tile, _round_up(S, 128))
    Rp = _round_up(R, RT)
    Sp = _round_up(S, TS)

    if (Rp, Sp) != (R, S):
        supp_f = jnp.pad(supp_f, ((0, Rp - R), (0, Sp - S)))
        query_f = jnp.pad(query_f, ((0, Rp - R), (0, Sp - S)))
        ws_rows = jnp.pad(ws_rows, ((0, Rp - R), (0, 0)))

    grid = (Rp // RT, Sp // TS)
    elt = jnp.dtype(dtype).itemsize
    cost = pl.CostEstimate(
        flops=3 * Rp * Sp,                        # sub, mul, add per element
        transcendentals=0,
        bytes_accessed=3 * Rp * Sp * elt + Rp * elt,   # 2 loads + 1 store + weights
    )

    out = pl.pallas_call(
        _fusion_kernel,
        out_shape=jax.ShapeDtypeStruct((Rp, Sp), dtype),
        grid_spec=pltpu.PrefetchScalarGridSpec(
            num_scalar_prefetch=0,
            grid=grid,
            in_specs=[
                pl.BlockSpec((RT, 1), lambda i, j: (i, 0)),    # per-row weight
                pl.BlockSpec((RT, TS), lambda i, j: (i, j)),   # supp attention
                pl.BlockSpec((RT, TS), lambda i, j: (i, j)),   # query attention
            ],
            out_specs=pl.BlockSpec((RT, TS), lambda i, j: (i, j)),
        ),
        compiler_params=pltpu.CompilerParams(
            dimension_semantics=("parallel", "parallel"),
            vmem_limit_bytes=vmem_limit_bytes,
        ),
        cost_estimate=cost,
    )(ws_rows, supp_f, query_f)

    return out[:R, :S].reshape(N, C, D, H, W)


class WeightFusionModule:
    """JAX/Pallas port of the PyTorch WeightFusionModule."""

    def __init__(self, num_channel):
        self.num_channel = num_channel
        # Parameter(torch.zeros(C,1,1,1,1)) with sigmoid applied at __init__
        # (as in the PyTorch module) -> per-channel weight sigmoid(0) = 0.5.
        raw = jnp.zeros((num_channel,), dtype=jnp.float32)
        self.supp_weight = jax.nn.sigmoid(raw)          # (C,)

    def __call__(self, supp_attention, query_attention):
        return weight_fusion(supp_attention, query_attention, self.supp_weight)


if __name__ == "__main__":
    key = jax.random.PRNGKey(0)
    k1, k2 = jax.random.split(key)

    N, C, D, H, W = 2, 4, 8, 8, 8   # small NCDHW volumes
    supp = jax.random.normal(k1, (N, C, D, H, W), dtype=jnp.float32)
    query = jax.random.normal(k2, (N, C, D, H, W), dtype=jnp.float32)

    module = WeightFusionModule(num_channel=C)
    out = module(supp, query)
    out = jax.block_until_ready(out)

    # Reference check (pure JAX) — per-channel weighted sum.
    ws = module.supp_weight.reshape(1, C, 1, 1, 1)
    ref = supp * ws + query * (1.0 - ws)
    assert out.shape == (N, C, D, H, W)
    assert jnp.allclose(out, ref, atol=1e-5), "mismatch vs reference"

    print("KERNEL_OK")
</pallas_src>

<mosaic_0001>
module attributes {stable_mosaic.version = 11 : i64} {
  func.func @_fusion_kernel(%arg0: i32, %arg1: i32, %arg2: memref<8x1xf32, #tpu.memory_space<vmem>>, %arg3: memref<8x512xf32, #tpu.memory_space<vmem>>, %arg4: memref<8x512xf32, #tpu.memory_space<vmem>>, %arg5: memref<8x512xf32, #tpu.memory_space<vmem>>) attributes {dimension_semantics = [#tpu.dimension_semantics<parallel>, #tpu.dimension_semantics<parallel>], iteration_bounds = array<i64: 1, 1>, scalar_prefetch = 0 : i64, scratch_operands = 0 : i64, tpu.core_type = #tpu.core_type<tc>, window_params = [{transform_indices = @transform_0, window_bounds = array<i64: 8, 1>}, {transform_indices = @transform_1, window_bounds = array<i64: 8, 512>}, {transform_indices = @transform_2, window_bounds = array<i64: 8, 512>}, {transform_indices = @transform_3, window_bounds = array<i64: 8, 512>}]} {
    %c0 = arith.constant 0 : index
    %c0_0 = arith.constant 0 : index
    %0 = vector.load %arg2[%c0, %c0_0] : memref<8x1xf32, #tpu.memory_space<vmem>>, vector<8x1xf32>
    %c0_1 = arith.constant 0 : index
    %c0_2 = arith.constant 0 : index
    %1 = vector.load %arg3[%c0_1, %c0_2] : memref<8x512xf32, #tpu.memory_space<vmem>>, vector<8x512xf32>
    %c0_3 = arith.constant 0 : index
    %c0_4 = arith.constant 0 : index
    %2 = vector.load %arg4[%c0_3, %c0_4] : memref<8x512xf32, #tpu.memory_space<vmem>>, vector<8x512xf32>
    %3 = arith.subf %1, %2 : vector<8x512xf32>
    %4 = vector.broadcast %0 : vector<8x1xf32> to vector<8x512xf32>
    %5 = arith.mulf %4, %3 : vector<8x512xf32>
    %6 = arith.addf %2, %5 : vector<8x512xf32>
    %c0_5 = arith.constant 0 : index
    %c0_6 = arith.constant 0 : index
    %7 = vector.load %arg5[%c0_5, %c0_6] : memref<8x512xf32, #tpu.memory_space<vmem>>, vector<8x512xf32>
    tpu.vector_store %arg5[%c0_5, %c0_6], %6 {strides = array<i32>} : memref<8x512xf32, #tpu.memory_space<vmem>>, vector<8x512xf32>,
    return
  }
  func.func @transform_0(%arg0: i32, %arg1: i32) -> (i32, i32) {
    %c0_i32 = arith.constant 0 : i32
    %c0_i32_0 = arith.constant 0 : i32
    return %arg0, %c0_i32 : i32, i32
  }
  func.func @transform_1(%arg0: i32, %arg1: i32) -> (i32, i32) {
    %c0_i32 = arith.constant 0 : i32
    return %arg0, %arg1 : i32, i32
  }
  func.func @transform_2(%arg0: i32, %arg1: i32) -> (i32, i32) {
    %c0_i32 = arith.constant 0 : i32
    return %arg0, %arg1 : i32, i32
  }
  func.func @transform_3(%arg0: i32, %arg1: i32) -> (i32, i32) {
    %c0_i32 = arith.constant 0 : i32
    return %arg0, %arg1 : i32, i32
  }
}

</mosaic_0001>

<bundles_post_ra>
// kernel: tpu_custom_call.1
= control target key start
LH: loop header
LB: loop body
LE: loop exit
PB: predicated region body
PF: predicated region fallthrough
CT: control target
= control target key end

     0   :  { %8 = vsyncpa [#allocation3], 0  ;;  %s225_s0 = inlined_call_operand.vmem [shape: f32[8,1], index: 0, kind: input, shape index: {}]   ;;  %s226_s1 = inlined_call_operand.hbm [shape: f32[8,512], index: 1, kind: input, shape index: {}]   ;;  %s227_s2 = inlined_call_operand.hbm [shape: f32[8,512], index: 2, kind: input, shape index: {}]   ;;  %s228_s3 = inlined_call_operand.hbm [shape: f32[8,512], index: 3, kind: output, shape index: {}]  }
   0x1   :  { %9 = vsyncpa [#allocation6], 0 }
   0x2   :  { %10 = vsyncpa [#allocation4], 0  ;;  %s162_s12 = smov [#allocation2]   ;;  %s163_s14 = smov [#allocation5]  }
   0x3   :  { %s19_s13 = sshll.u32 %s162_s12, 4  ;;  %s29_s15 = sshll.u32 %s163_s14, 4  ;;  %s20_s13 = int_to_ptr.vmem [resolvable:$true] %s19_s13  ;;  %s30_s15 = int_to_ptr.vmem [resolvable:$true] %s29_s15 }
   0x4   :  { %s90_s18 = scalar_lea.hbm %s226_s1, 512 }
   0x5   :  { %p91_p0 = scmp.ne.s32.totalorder %s226_s1, %s90_s18  ;;  %p94_p1 = scmp.lt.u32.totalorder %s90_s18, %s226_s1 }
   0x7   :  { %p96_p2 = pnand %p94_p1, %p91_p0 }
   0x9   :  { %99 = shalt.err (!%p96_p2)
}
   0xa   :  { %s100_s23 = scalar_lea.vmem %s20_s13, 512  ;;  %p105_p4 = scmp.lt.s32.totalorder %s20_s13, %s20_s13 }
   0xb   :  { %p101_p3 = scmp.ne.s32.totalorder %s20_s13, %s100_s23  ;;  %p106_p5 = scmp.lt.s32.totalorder %s100_s23, %s100_s23 }
   0xd   :  { %p107_p6 = por %p106_p5, %p105_p4 }
   0xf   :  { %p108_p7 = pnand %p107_p6, %p101_p3 }
  0x11   :  { %111 = shalt.err (!%p108_p7)
}
  0x12   :  { %22 = dma.hbm_to_vmem [thread:$0]  %s226_s1, 512, %s20_s13, [#allocation3]  }
  0x13   :  { %s112_s28 = scalar_lea.hbm %s227_s2, 512 }
  0x14   :  { %p113_p8 = scmp.ne.s32.totalorder %s227_s2, %s112_s28  ;;  %p116_p9 = scmp.lt.u32.totalorder %s112_s28, %s227_s2 }
  0x16   :  { %p118_p10 = pnand %p116_p9, %p113_p8 }
  0x18   :  { %121 = shalt.err (!%p118_p10)
}
  0x19   :  { %s122_s6 = scalar_lea.vmem %s30_s15, 512  ;;  %p127_p12 = scmp.lt.s32.totalorder %s30_s15, %s30_s15 }
  0x1a   :  { %p123_p11 = scmp.ne.s32.totalorder %s30_s15, %s122_s6  ;;  %p128_p13 = scmp.lt.s32.totalorder %s122_s6, %s122_s6 }
  0x1c   :  { %p129_p0 = por %p128_p13, %p127_p12 }
  0x1e   :  { %p130_p1 = pnand %p129_p0, %p123_p11 }
  0x20   :  { %133 = shalt.err (!%p130_p1)
}
  0x21   :  { %32 = dma.hbm_to_vmem [thread:$0]  %s227_s2, 512, %s30_s15, [#allocation6]  }
  0x22   :  { %156 = dma.done.wait [#allocation3], 512  }
  0x23   :  { %157 = vsyncadd [#allocation3], 4294966784 }
  0x24   :  { %158 = dma.done.wait [#allocation6], 512  }
  0x25   :  { %159 = vsyncadd [#allocation6], 4294966784  ;;  %v164_v0 = vmov 0   ;;  %v39_v1 = vld [vmem:[%s225_s0] sm:$0xff]  ;;  %v40_v2 = vld [vmem:[#allocation2] sm:$0xff]  ;;  %s165_s2 = smov [#allocation7]  }
  0x26   :  { %89 = vset.pattern.permute.xlu0 %v164_v0  ;;  %v41_v3 = vld [vmem:[#allocation2 + $0x8] sm:$0xff]  ;;  %v42_v4 = vld [vmem:[#allocation2 + $0x10] sm:$0xff]  ;;  %v43_v5 = vld [vmem:[#allocation2 + $0x18] sm:$0xff]  ;;  %s75_s10 = sshll.u32 %s165_s2, 4  ;;  %s76_s10 = int_to_ptr.vmem [resolvable:$true] %s75_s10 }
  0x27   :  { %54 = vperm.xlu0 %89, %v39_v1   ;;  %v44_v6 = vld [vmem:[#allocation5] sm:$0xff]  ;;  %v45_v7 = vld [vmem:[#allocation5 + $0x8] sm:$0xff]  ;;  %v46_v8 = vld [vmem:[#allocation5 + $0x10] sm:$0xff]  ;;  %s134_s0 = scalar_lea.vmem %s76_s10, 512  ;;  %p139_p3 = scmp.lt.s32.totalorder %s76_s10, %s76_s10 }
  0x28   :  { %v47_v9 = vld [vmem:[#allocation5 + $0x18] sm:$0xff]  ;;  %v48_v10 = vsub.f32 %v40_v2, %v44_v6  ;;  %v49_v11 = vsub.f32 %v41_v3, %v45_v7  ;;  %v50_v12 = vsub.f32 %v42_v4, %v46_v8  ;;  %p135_p2 = scmp.ne.s32.totalorder %s76_s10, %s134_s0  ;;  %p140_p4 = scmp.lt.s32.totalorder %s134_s0, %s134_s0 }
  0x29   :  { %v51_v13 = vsub.f32 %v43_v5, %v47_v9 }
  0x2a   :  { %p141_p5 = por %p140_p4, %p139_p3 }
  0x2c   :  { %p142_p6 = pnand %p141_p5, %p135_p2 }
  0xa6   :  { %v55_v14 = vpop.permute.xlu0 %54 }
  0xa7   :  { %v57_v15 = vmul.f32 %v55_v14, %v48_v10  ;;  %v58_v16 = vmul.f32 %v55_v14, %v49_v11  ;;  %v59_v17 = vmul.f32 %v55_v14, %v50_v12  ;;  %v60_v18 = vmul.f32 %v55_v14, %v51_v13 }
  0xa9   :  { %v61_v19 = vadd.f32 %v57_v15, %v44_v6  ;;  %v62_v20 = vadd.f32 %v58_v16, %v45_v7  ;;  %v63_v21 = vadd.f32 %v59_v17, %v46_v8  ;;  %v64_v22 = vadd.f32 %v60_v18, %v47_v9 }
  0xab   :  { %65 = vst [vmem:[#allocation7] sm:$0xff] %v61_v19  ;;  %66 = vst [vmem:[#allocation7 + $0x8] sm:$0xff] %v62_v20 }
  0xac   :  { %67 = vst [vmem:[#allocation7 + $0x10] sm:$0xff] %v63_v21  ;;  %68 = vst [vmem:[#allocation7 + $0x18] sm:$0xff] %v64_v22 }
  0xad   :  { %145 = shalt.err (!%p142_p6)
}
  0xae   :  { %s146_s13 = scalar_lea.hbm %s228_s3, 512 }
  0xaf   :  { %p147_p7 = scmp.ne.s32.totalorder %s228_s3, %s146_s13  ;;  %p150_p8 = scmp.lt.u32.totalorder %s146_s13, %s228_s3 }
  0xb1   :  { %p152_p9 = pnand %p150_p8, %p147_p7 }
  0xb3   :  { %155 = shalt.err (!%p152_p9)
}
  0xb4   :  { %78 = dma.vmem_to_hbm [thread:$0]  %s76_s10, 512, %s228_s3, [#allocation4]  }
  0xb5   :  { %160 = dma.done.wait [#allocation4], 512  }
  0xb6   :  { %161 = vsyncadd [#allocation4], 4294966784 }
  0xb7   :  { %82 = vsyncpa [#allocation3], 1 }
  0xb8   :  { %83 = vsyncpa [#allocation6], 1 }
  0xb9   :  { %84 = vsyncpa [#allocation4], 1 }

</bundles_post_ra>
